<compile_context>
chip_gen: v6e
topology: v6e:2x2x1
jax: 0.10.0
libtpu: 0.0.40
codegen_flags: <defaults>
</compile_context>

<pallas_src>
import functools

import jax
import jax.numpy as jnp
from jax.experimental import pallas as pl
from jax.experimental.pallas import tpu as pltpu

LANES = 128
NPARTS = 2  # leading "parallel" grid axis: lets dual-TC chips split the reduction


def _abs_pow(x, power):
    """|x|^power, specialized so p=2 / p=1 stay on the VPU (no EUP pow)."""
    if power == 2.0:
        return x * x
    if power == 1.0:
        return jnp.abs(x)
    return jnp.abs(x) ** power


def _reduce_kernel(x_ref, o_ref, acc_ref, *, power, rows, br, spp, need_mask):
    c = pl.program_id(0)   # partial-sum partition (parallel)
    j = pl.program_id(1)   # reduction steps within the partition (arbitrary)

    @pl.when(j == 0)
    def _():
        acc_ref[...] = jnp.zeros_like(acc_ref)

    x = x_ref[...].astype(jnp.float32)
    if need_mask:
        # Zero rows past the true extent (edge-block contents are undefined, and
        # fully-out-of-range blocks are clamped duplicates) BEFORE pow/sum.
        blk = c * spp + j
        row_idx = blk * br + jax.lax.broadcasted_iota(jnp.int32, x.shape, 0)
        x = jnp.where(row_idx < rows, x, 0.0)

    acc_ref[...] += _abs_pow(x, power)        # pure VPU adds in the hot loop

    @pl.when(j == pl.num_programs(1) - 1)
    def _():
        # Single cross-lane/sublane reduce + scalar SMEM write per partition.
        o_ref[0, 0] = jnp.sum(acc_ref[...])


def _sum_abs_pow_pallas(x2, power, block_rows):
    """sum(|x|^power) over a [rows, 128] slab via a Pallas reduction kernel."""
    rows = x2.shape[0]
    if rows <= block_rows:
        br = rows                               # full-dims block: always layout-legal
        steps_total = 1
    else:
        br = block_rows
        steps_total = pl.cdiv(rows, br)

    nparts = min(NPARTS, steps_total)
    spp = pl.cdiv(steps_total, nparts)          # reduction steps per partition
    need_mask = (nparts * spp * br) != rows
    last_blk = steps_total - 1

    def x_index_map(c, j):
        blk = c * spp + j
        if need_mask:
            blk = jnp.minimum(blk, last_blk)    # clamp fully-out-of-range blocks
        return blk, 0

    partials = pl.pallas_call(
        functools.partial(
            _reduce_kernel, power=power, rows=rows, br=br, spp=spp,
            need_mask=need_mask),
        out_shape=jax.ShapeDtypeStruct((nparts, 1), jnp.float32),
        grid=(nparts, spp),
        in_specs=[pl.BlockSpec((br, LANES), x_index_map)],
        out_specs=pl.BlockSpec((1, 1), lambda c, j: (c, 0),
                               memory_space=pltpu.SMEM),
        scratch_shapes=[pltpu.VMEM((br, LANES), jnp.float32)],
        compiler_params=pltpu.CompilerParams(
            dimension_semantics=("parallel", "arbitrary")),
    )(x2)
    return jnp.sum(partials)


def _sum_abs_pow(x, power, block_rows, min_pallas_elems):
    """sum(|x|^power) over the whole tensor (any shape / float dtype)."""
    flat = x.reshape(-1)                 # free layout change; no pad, no astype
    n = flat.shape[0]
    if n < max(min_pallas_elems, LANES):
        # Tiny tensor: a pallas_call launch would dwarf the actual work.
        return jnp.sum(_abs_pow(flat.astype(jnp.float32), power))

    rem = n % LANES
    n_main = n - rem
    main = flat if rem == 0 else jax.lax.slice(flat, (0,), (n_main,))
    total = _sum_abs_pow_pallas(
        main.reshape(n_main // LANES, LANES), power, block_rows)
    if rem:                              # < 128 leftover elements: plain jnp
        tail = jax.lax.slice(flat, (n_main,), (n,))
        total = total + jnp.sum(_abs_pow(tail.astype(jnp.float32), power))
    return total


def gradient_norm(grads, power, normalize_by_batch=False, *,
                  block_rows=2048, min_pallas_elems=1 << 16):
    """JAX/Pallas equivalent of GradientNorm.forward(grads).

    Returns sum_i ||grad_i||_p * B_i^(-1/p)   (B_i = 1 unless normalize_by_batch).
    """
    power = float(power)
    total = jnp.float32(0.0)
    for g in grads:
        B = float(g.shape[0]) if normalize_by_batch else 1.0
        s = _sum_abs_pow(g, power, block_rows, min_pallas_elems)   # sum |x|^p
        total = total + s ** (1.0 / power) * (B ** (-1.0 / power))
    return total


if __name__ == "__main__":
    key = jax.random.PRNGKey(0)
    ks = jax.random.split(key, 6)

    # A small "list of gradients": conv-weight-like, bias-like, ragged, bf16, etc.
    grads = [
        jax.random.normal(ks[0], (2, 4, 16, 16), dtype=jnp.float32),   # NCHW grad
        jax.random.normal(ks[1], (4, 32), dtype=jnp.float32),          # tiny -> jnp path
        jax.random.normal(ks[2], (8, 32), dtype=jnp.float32),          # tiny -> jnp path
        jax.random.normal(ks[3], (2563,), dtype=jnp.float32),          # ragged: bulk + tail
        jax.random.normal(ks[4], (4, 8, 16, 16),
                          dtype=jnp.float32).astype(jnp.bfloat16),     # bf16 grad
        jax.random.normal(ks[5], (5, 32, 32), dtype=jnp.float32),      # 40-row slab
    ]

    def ref_gradient_norm(gs, power, normalize_by_batch=False):
        total = jnp.float32(0.0)
        for g in gs:
            B = float(g.shape[0]) if normalize_by_batch else 1.0
            gf = g.astype(jnp.float32)
            total = total + jnp.sum(jnp.abs(gf) ** float(power)) ** (1.0 / power) * (
                B ** (-1.0 / power))
        return total

    # min_pallas_elems=1024 so the larger example tensors exercise the Pallas path;
    # block_rows=16 additionally exercises multi-block, partial-edge masking,
    # clamped blocks and the 2-partition parallel split at these small sizes.
    checks = [
        dict(power=2.0, normalize_by_batch=False, block_rows=2048),
        dict(power=2.0, normalize_by_batch=False, block_rows=16),
        dict(power=1.0, normalize_by_batch=True, block_rows=16),
        dict(power=3.0, normalize_by_batch=True, block_rows=16),
    ]
    for cfg in checks:
        out = gradient_norm(grads, cfg["power"], cfg["normalize_by_batch"],
                            block_rows=cfg["block_rows"], min_pallas_elems=1024)
        out = jax.block_until_ready(out)
        ref = ref_gradient_norm(grads, cfg["power"], cfg["normalize_by_batch"])
        assert jnp.allclose(out, ref, rtol=1e-4, atol=1e-5), (cfg, out, ref)

    print("KERNEL_OK")
</pallas_src>

<mosaic_0001>
module attributes {stable_mosaic.version = 11 : i64} {
  func.func @_reduce_kernel(%arg0: i32, %arg1: i32, %arg2: memref<16x128xf32, #tpu.memory_space<vmem>>, %arg3: memref<1x1xf32, #tpu.memory_space<smem>>, %arg4: memref<16x128xf32, #tpu.memory_space<vmem>>) attributes {dimension_semantics = [#tpu.dimension_semantics<parallel>, #tpu.dimension_semantics<arbitrary>], iteration_bounds = array<i64: 1, 1>, scalar_prefetch = 0 : i64, scratch_operands = 1 : i64, tpu.core_type = #tpu.core_type<tc>, window_params = [{transform_indices = @transform_0, window_bounds = array<i64: 16, 128>}, {transform_indices = @transform_1, window_bounds = array<i64: 1, 1>}]} {
    %c0_i32 = arith.constant 0 : i32
    %0 = arith.cmpi eq, %arg1, %c0_i32 : i32
    %1 = arith.extui %0 : i1 to i32
    %c0_i32_0 = arith.constant 0 : i32
    %2 = arith.cmpi ne, %1, %c0_i32_0 : i32
    scf.if %2 {
      %cst = arith.constant 0.000000e+00 : f32
      %11 = vector.broadcast %cst : f32 to vector<16x128xf32>
      %c0_8 = arith.constant 0 : index
      %c0_9 = arith.constant 0 : index
      %12 = vector.load %arg4[%c0_8, %c0_9] : memref<16x128xf32, #tpu.memory_space<vmem>>, vector<16x128xf32>
      tpu.vector_store %arg4[%c0_8, %c0_9], %11 {strides = array<i32>} : memref<16x128xf32, #tpu.memory_space<vmem>>, vector<16x128xf32>,
    } else {
    }
    %c0 = arith.constant 0 : index
    %c0_1 = arith.constant 0 : index
    %3 = vector.load %arg2[%c0, %c0_1] : memref<16x128xf32, #tpu.memory_space<vmem>>, vector<16x128xf32>
    %c0_2 = arith.constant 0 : index
    %c0_3 = arith.constant 0 : index
    %4 = vector.load %arg4[%c0_2, %c0_3] : memref<16x128xf32, #tpu.memory_space<vmem>>, vector<16x128xf32>
    %5 = arith.mulf %3, %3 : vector<16x128xf32>
    %6 = arith.addf %4, %5 : vector<16x128xf32>
    %c0_4 = arith.constant 0 : index
    %c0_5 = arith.constant 0 : index
    %7 = vector.load %arg4[%c0_4, %c0_5] : memref<16x128xf32, #tpu.memory_space<vmem>>, vector<16x128xf32>
    tpu.vector_store %arg4[%c0_4, %c0_5], %6 {strides = array<i32>} : memref<16x128xf32, #tpu.memory_space<vmem>>, vector<16x128xf32>,
    %c0_i32_6 = arith.constant 0 : i32
    %8 = arith.cmpi eq, %arg1, %c0_i32_6 : i32
    %9 = arith.extui %8 : i1 to i32
    %c0_i32_7 = arith.constant 0 : i32
    %10 = arith.cmpi ne, %9, %c0_i32_7 : i32
    scf.if %10 {
      %c0_8 = arith.constant 0 : index
      %c0_9 = arith.constant 0 : index
      %11 = vector.load %arg4[%c0_8, %c0_9] : memref<16x128xf32, #tpu.memory_space<vmem>>, vector<16x128xf32>
      %12 = vector.shape_cast %11 : vector<16x128xf32> to vector<1x16x128xf32>
      %cst = arith.constant dense<0.000000e+00> : vector<1xf32>
      %13 = vector.multi_reduction <add>, %12, %cst [1, 2] : vector<1x16x128xf32> to vector<1xf32>
      %14 = vector.shape_cast %13 : vector<1xf32> to vector<1x1x1xf32>
      %15 = vector.extract %14[0, 0, 0] : f32 from vector<1x1x1xf32>
      %c0_10 = arith.constant 0 : index
      %c0_11 = arith.constant 0 : index
      %16 = memref.load %arg3[%c0_10, %c0_11] : memref<1x1xf32, #tpu.memory_space<smem>>
      memref.store %15, %arg3[%c0_10, %c0_11] : memref<1x1xf32, #tpu.memory_space<smem>>
    } else {
    }
    return
  }
  func.func @transform_0(%arg0: i32, %arg1: i32) -> (i32, i32) {
    %c1_i32 = arith.constant 1 : i32
    %0 = arith.muli %arg0, %c1_i32 : i32
    %1 = arith.addi %0, %arg1 : i32
    %c0_i32 = arith.constant 0 : i32
    %c0_i32_0 = arith.constant 0 : i32
    return %1, %c0_i32 : i32, i32
  }
  func.func @transform_1(%arg0: i32, %arg1: i32) -> (i32, i32) {
    %c0_i32 = arith.constant 0 : i32
    %c0_i32_0 = arith.constant 0 : i32
    return %arg0, %c0_i32 : i32, i32
  }
}

</mosaic_0001>

<bundles_post_ra>
// kernel: tpu_custom_call.1
= control target key start
LH: loop header
LB: loop body
LE: loop exit
PB: predicated region body
PF: predicated region fallthrough
CT: control target
= control target key end

     0   :  { %6 = vsyncpa [#allocation4], 0  ;;  %s134_s0 = inlined_call_operand.hbm [shape: f32[16,128], index: 0, kind: input, shape index: {}]   ;;  %s135_s1 = inlined_call_operand.hbm [shape: f32[1,1], index: 1, kind: output, shape index: {}]  }
   0x1   :  { %7 = vsyncpa [#allocation5], 0  ;;  %s114_s6 = smov [#allocation3]  }
   0x2   :  { %s17_s7 = sshll.u32 %s114_s6, 4  ;;  %s18_s7 = int_to_ptr.vmem [resolvable:$true] %s17_s7 }
   0x3   :  { %s90_s8 = scalar_lea.vmem %s18_s7, 256  ;;  %p95_p1 = scmp.lt.s32.totalorder %s18_s7, %s18_s7 }
   0x4   :  { %p91_p0 = scmp.ne.s32.totalorder %s18_s7, %s90_s8  ;;  %p96_p2 = scmp.lt.s32.totalorder %s90_s8, %s90_s8 }
   0x6   :  { %p97_p3 = por %p96_p2, %p95_p1 }
   0x8   :  { %p98_p4 = pnand %p97_p3, %p91_p0 }
   0xa   :  { %101 = shalt.err (!%p98_p4)
}
   0xb   :  { %s115_s9 = smov 128   ;;  %s116_s10 = smov 8  }
   0xc   :  { %23 = dma.hbm_to_vmem [thread:$0]  %s134_s0, 256, %s18_s7, [#allocation4], %s115_s9, %s115_s9, %s116_s10  }
   0xd   :  { %110 = dma.done.wait [#allocation4], 256  }
   0xe   :  { %111 = vsyncadd [#allocation4], 4294967040  ;;  %v35_v0 = vld [vmem:[#allocation3] sm:$0xff]  ;;  %v36_v1 = vld [vmem:[#allocation3 + $0x8] sm:$0xff]  ;;  %s117_s14 = smov [#allocation6]  }
   0xf   :  { %v39_v2 = vmul.f32 %v35_v0, %v35_v0  ;;  %v40_v3 = vmul.f32 %v36_v1, %v36_v1 }
  0x11   :  { %v50_v4 = vadd.f32 %v40_v3, %v39_v2 }
  0x13   :  { %51 = vadd.xlane.f32.xlu0 %v50_v4 }
  0x9c   :  { %v52_v5 = vpop.xlane.xlu0 %51 }
  0x9d   :  { %v53_v6 = vrot.slane %v52_v5, 4 }
  0x9f   :  { %v54_v7 = vadd.f32 %v53_v6, %v52_v5 }
  0xa1   :  { %v55_v8 = vrot.slane %v54_v7, 2 }
  0xa3   :  { %v56_v9 = vadd.f32 %v55_v8, %v54_v7 }
  0xa5   :  { %v57_v10 = vrot.slane %v56_v9, 1 }
  0xa7   :  { %v58_v11 = vadd.f32 %v57_v10, %v56_v9 }
  0xa9   :  { %76 = vpush %v58_v11 }
  0xda   :  { %s77_s13 = spop %76 }
  0xdb   :  { %61 = sst [smem:[#allocation6]] %s77_s13 }
  0xdc   :  { %69 = dma.smem_to_hbm %s117_s14, 16, %s135_s1, [#allocation5]  }
  0xdd   :  { %112 = dma.done.wait [#allocation5], 16  }
  0xde   :  { %113 = vsyncadd [#allocation5], 4294967280 }
  0xdf   :  { %73 = sfence }
  0xe0   :  { %74 = vsyncpa [#allocation4], 1 }
  0xe1   :  { %75 = vsyncpa [#allocation5], 1 }

</bundles_post_ra>
